<compile_context>
chip_gen: v7x
topology: tpu7x:2x2x1
jax: 0.10.0
libtpu: 0.0.40
codegen_flags: <defaults>
</compile_context>

<pallas_src>
import functools

import jax
import jax.numpy as jnp
import numpy as np
from jax.experimental import pallas as pl
from jax.experimental.pallas import tpu as pltpu

BN_EPS = 1e-5
_LANE = 128


# ---------------------------------------------------------------------------
# Kernel 1: conv (one matmul per parity) + per-channel sum / sum-of-squares.
# Output blocks have constant index maps -> they stay resident in VMEM and act
# as accumulators across the (arbitrary) grid axis.
# ---------------------------------------------------------------------------
def _conv_stats_kernel(slab_e_ref, slab_o_ref, w_ref, sum_ref, sumsq_ref):
    @pl.when(pl.program_id(0) == 0)
    def _():
        sum_ref[...] = jnp.zeros_like(sum_ref)
        sumsq_ref[...] = jnp.zeros_like(sumsq_ref)

    w = w_ref[...]                                               # (C_out, K*C_in)
    ye = jnp.dot(w, slab_e_ref[...], preferred_element_type=jnp.float32)
    yo = jnp.dot(w, slab_o_ref[...], preferred_element_type=jnp.float32)
    sum_ref[...] += (jnp.sum(ye, axis=1, keepdims=True)
                     + jnp.sum(yo, axis=1, keepdims=True))
    sumsq_ref[...] += (jnp.sum(ye * ye, axis=1, keepdims=True)
                       + jnp.sum(yo * yo, axis=1, keepdims=True))


# ---------------------------------------------------------------------------
# Kernel 2: conv (recompute) + BN affine + ReLU + MaxPool(2), fully fused.
# pool(relu(bn(y))) == max(max(scale*ye+shift, scale*yo+shift), 0); the affine
# must be applied before the max because scale may be negative.
# ---------------------------------------------------------------------------
def _apply_kernel(slab_e_ref, slab_o_ref, w_ref, scale_ref, shift_ref, o_ref):
    w = w_ref[...]
    ye = jnp.dot(w, slab_e_ref[...], preferred_element_type=jnp.float32)
    yo = jnp.dot(w, slab_o_ref[...], preferred_element_type=jnp.float32)
    scale = scale_ref[...]                                       # (C_out, 1)
    shift = shift_ref[...]
    ze = ye * scale + shift
    zo = yo * scale + shift
    o_ref[...] = jnp.maximum(jnp.maximum(ze, zo), 0.0)


# ---------------------------------------------------------------------------
# Host-side glue
# ---------------------------------------------------------------------------
def _pick_lane_tile(nl_pad, kc, c_out, vmem_budget_bytes=8 << 20):
    """Largest {1024..128}-lane tile dividing nl_pad that fits a VMEM budget.

    nl_pad is always a multiple of 128, so this always returns >= 128.
    Budget counts the two parity-slab blocks + output block, double-buffered.
    """
    for t in (1024, 512, 256, 128):
        if nl_pad % t:
            continue
        step_bytes = (2 * kc + c_out) * t * 4 * 2
        if step_bytes <= vmem_budget_bytes:
            return t
    return _LANE


def _parity_slab(xpad, parity, K, Lh):
    """im2col slab for output positions of a given parity.

    xpad: (N, C, L + K - 1).  Returns (K*C, N*Lh) with
      slab[k*C + c, n*Lh + j] = xpad[n, c, 2*j + parity + k].
    """
    N, C, _ = xpad.shape
    wins = [xpad[:, :, parity + k: parity + k + 2 * Lh: 2] for k in range(K)]
    slab = jnp.stack(wins, axis=1)                   # (N, K, C, Lh)
    slab = jnp.transpose(slab, (1, 2, 0, 3))         # (K, C, N, Lh)
    return slab.reshape(K * C, N * Lh)


@functools.partial(jax.jit, static_argnames=("padding",))
def rwconv_block(x, v, weight, bias, gamma, beta, *, padding=2):
    """x: (N, len(v), L) f32; weight: (C_out, C_in_full, K); bias/gamma/beta: (C_out,)."""
    del bias  # exactly cancelled by train-mode BatchNorm mean subtraction
    N, C_sel, L = x.shape
    C_out, _, K = weight.shape
    assert L % 2 == 0, "MaxPool1d(2) expects an even length"
    assert 2 * padding == K - 1, "stride-1 'same' conv assumed (kernel=5, padding=2)"
    Lh = L // 2
    NL = N * Lh            # pooled length folded over batch -> lane axis
    M = N * L              # elements per channel for BN batch statistics

    x32 = x.astype(jnp.float32)
    # TODO(synk): for very large inputs the pad + im2col layout prep (K-fold HBM
    # duplication) could be moved in-kernel with a halo index_map instead.
    xpad = jnp.pad(x32, ((0, 0), (0, 0), (padding, padding)))
    slab_e = _parity_slab(xpad, 0, K, Lh)            # (K*C_sel, N*Lh)
    slab_o = _parity_slab(xpad, 1, K, Lh)

    KC = K * C_sel
    # Pad the lane axis to a multiple of 128: lane-dense unmasked stores and a
    # real pipelined grid regardless of N*L/2.  Zero columns are exact no-ops
    # for the BN statistics (divide by true M below) and get sliced off at the
    # end for the apply sweep.
    NLpad = ((NL + _LANE - 1) // _LANE) * _LANE
    if NLpad != NL:
        slab_e = jnp.pad(slab_e, ((0, 0), (0, NLpad - NL)))
        slab_o = jnp.pad(slab_o, ((0, 0), (0, NLpad - NL)))

    # RWConv1d weight view-selection + repack so contraction index = k*C_sel + c.
    w_sel = weight[:, v, :].astype(jnp.float32)                       # (C_out, C_sel, K)
    w2 = jnp.transpose(w_sel, (0, 2, 1)).reshape(C_out, KC)           # (C_out, K*C_sel)

    tile = _pick_lane_tile(NLpad, KC, C_out)
    T = NLpad // tile

    slab_spec = pl.BlockSpec((KC, tile), lambda t: (0, t))
    w_spec = pl.BlockSpec((C_out, KC), lambda t: (0, 0))
    col_spec = pl.BlockSpec((C_out, 1), lambda t: (0, 0))

    # ---- sweep 1: conv + BN batch statistics (fused, no activation stored) ----
    ch_sum, ch_sumsq = pl.pallas_call(
        _conv_stats_kernel,
        out_shape=(jax.ShapeDtypeStruct((C_out, 1), jnp.float32),
                   jax.ShapeDtypeStruct((C_out, 1), jnp.float32)),
        grid=(T,),
        in_specs=[slab_spec, slab_spec, w_spec],
        out_specs=(col_spec, col_spec),
        compiler_params=pltpu.CompilerParams(dimension_semantics=("arbitrary",)),
    )(slab_e, slab_o, w2)

    # Tiny per-channel math: plain-JAX glue (C_out scalars), fused by the jit.
    mu = ch_sum / M
    var = jnp.maximum(ch_sumsq / M - mu * mu, 0.0)   # biased batch variance
    scale = gamma.reshape(C_out, 1).astype(jnp.float32) * jax.lax.rsqrt(var + BN_EPS)
    shift = beta.reshape(C_out, 1).astype(jnp.float32) - mu * scale

    # ---- sweep 2: conv (recompute) + BN affine + ReLU + MaxPool, lane-dense ----
    out2 = pl.pallas_call(
        _apply_kernel,
        out_shape=jax.ShapeDtypeStruct((C_out, NLpad), jnp.float32),
        grid=(T,),
        in_specs=[slab_spec, slab_spec, w_spec, col_spec, col_spec],
        out_specs=pl.BlockSpec((C_out, tile), lambda t: (0, t)),
        compiler_params=pltpu.CompilerParams(dimension_semantics=("parallel",)),
    )(slab_e, slab_o, w2, scale, shift)

    # (C_out, N*Lh [+pad]) -> (N, C_out, Lh)
    out2 = out2[:, :NL]
    return jnp.transpose(out2.reshape(C_out, N, Lh), (1, 0, 2))


def rwconv_block_ref(x, v, weight, bias, gamma, beta, padding=2):
    """Pure-JAX reference mirroring the PyTorch forward (training-mode BN)."""
    w = weight[:, v, :]
    C_out, C_sel, K = w.shape
    N, _, L = x.shape
    xpad = jnp.pad(x, ((0, 0), (0, 0), (padding, padding)))
    y = jnp.zeros((N, C_out, L), jnp.float32)
    for k in range(K):
        y = y + jnp.einsum("oc,ncl->nol", w[:, :, k], xpad[:, :, k:k + L])
    y = y + bias[None, :, None]
    mu = y.mean(axis=(0, 2), keepdims=True)
    var = ((y - mu) ** 2).mean(axis=(0, 2), keepdims=True)
    y = (y - mu) / jnp.sqrt(var + BN_EPS) * gamma[None, :, None] + beta[None, :, None]
    y = jnp.maximum(y, 0.0)
    return jnp.max(y.reshape(N, C_out, L // 2, 2), axis=-1)


if __name__ == "__main__":
    key = jax.random.PRNGKey(0)
    k1, k2, k3, k4, k5 = jax.random.split(key, 5)

    # Small shapes consistent with the module: Conv1d inputs are (N, C, L).
    N, C_IN_FULL, C_OUT, L, K, PAD = 2, 6, 8, 16, 5, 2
    v = jnp.array([0, 2, 3, 5], dtype=jnp.int32)   # selected "views" (input channels)
    C_SEL = int(v.shape[0])

    x = jax.random.normal(k1, (N, C_SEL, L), jnp.float32)
    weight = 0.1 * jax.random.normal(k2, (C_OUT, C_IN_FULL, K), jnp.float32)
    bias = 0.1 * jax.random.normal(k3, (C_OUT,), jnp.float32)
    gamma = 1.0 + 0.1 * jax.random.normal(k4, (C_OUT,), jnp.float32)
    beta = 0.1 * jax.random.normal(k5, (C_OUT,), jnp.float32)

    out = rwconv_block(x, v, weight, bias, gamma, beta, padding=PAD)
    out = jax.block_until_ready(out)

    ref = rwconv_block_ref(x, v, weight, bias, gamma, beta, PAD)
    assert out.shape == (N, C_OUT, L // 2)
    np.testing.assert_allclose(np.asarray(out), np.asarray(ref), rtol=1e-4, atol=1e-4)

    print("KERNEL_OK")
</pallas_src>

<mosaic_0001>
module attributes {stable_mosaic.version = 11 : i64} {
  func.func @_apply_kernel(%arg0: i32, %arg1: memref<20x128xf32, #tpu.memory_space<vmem>>, %arg2: memref<20x128xf32, #tpu.memory_space<vmem>>, %arg3: memref<8x20xf32, #tpu.memory_space<vmem>>, %arg4: memref<8x1xf32, #tpu.memory_space<vmem>>, %arg5: memref<8x1xf32, #tpu.memory_space<vmem>>, %arg6: memref<8x128xf32, #tpu.memory_space<vmem>>) attributes {dimension_semantics = [#tpu.dimension_semantics<parallel>], iteration_bounds = array<i64: 1>, scalar_prefetch = 0 : i64, scratch_operands = 0 : i64, tpu.core_type = #tpu.core_type<tc>, window_params = [{transform_indices = @transform_0, window_bounds = array<i64: 20, 128>}, {transform_indices = @transform_1, window_bounds = array<i64: 20, 128>}, {pipeline_mode = #tpu.pipeline_mode<synchronous>, transform_indices = @transform_2, window_bounds = array<i64: 8, 20>}, {pipeline_mode = #tpu.pipeline_mode<synchronous>, transform_indices = @transform_3, window_bounds = array<i64: 8, 1>}, {pipeline_mode = #tpu.pipeline_mode<synchronous>, transform_indices = @transform_4, window_bounds = array<i64: 8, 1>}, {transform_indices = @transform_5, window_bounds = array<i64: 8, 128>}]} {
    %c0 = arith.constant 0 : index
    %c0_0 = arith.constant 0 : index
    %0 = vector.load %arg3[%c0, %c0_0] : memref<8x20xf32, #tpu.memory_space<vmem>>, vector<8x20xf32>
    %c0_1 = arith.constant 0 : index
    %c0_2 = arith.constant 0 : index
    %1 = vector.load %arg1[%c0_1, %c0_2] : memref<20x128xf32, #tpu.memory_space<vmem>>, vector<20x128xf32>
    %cst = arith.constant dense<0.000000e+00> : vector<8x128xf32>
    %2 = tpu.matmul %0, %1, %cst {dimension_numbers = #tpu.dot_dimension_numbers<[1], [0], [0], [1], [0, 0, 1, 1], [], []>} : vector<8x20xf32>, vector<20x128xf32>, vector<8x128xf32> -> vector<8x128xf32>
    %c0_3 = arith.constant 0 : index
    %c0_4 = arith.constant 0 : index
    %3 = vector.load %arg2[%c0_3, %c0_4] : memref<20x128xf32, #tpu.memory_space<vmem>>, vector<20x128xf32>
    %cst_5 = arith.constant dense<0.000000e+00> : vector<8x128xf32>
    %4 = tpu.matmul %0, %3, %cst_5 {dimension_numbers = #tpu.dot_dimension_numbers<[1], [0], [0], [1], [0, 0, 1, 1], [], []>} : vector<8x20xf32>, vector<20x128xf32>, vector<8x128xf32> -> vector<8x128xf32>
    %c0_6 = arith.constant 0 : index
    %c0_7 = arith.constant 0 : index
    %5 = vector.load %arg4[%c0_6, %c0_7] : memref<8x1xf32, #tpu.memory_space<vmem>>, vector<8x1xf32>
    %c0_8 = arith.constant 0 : index
    %c0_9 = arith.constant 0 : index
    %6 = vector.load %arg5[%c0_8, %c0_9] : memref<8x1xf32, #tpu.memory_space<vmem>>, vector<8x1xf32>
    %7 = vector.broadcast %5 : vector<8x1xf32> to vector<8x128xf32>
    %8 = arith.mulf %2, %7 : vector<8x128xf32>
    %9 = vector.broadcast %6 : vector<8x1xf32> to vector<8x128xf32>
    %10 = arith.addf %8, %9 : vector<8x128xf32>
    %11 = vector.broadcast %5 : vector<8x1xf32> to vector<8x128xf32>
    %12 = arith.mulf %4, %11 : vector<8x128xf32>
    %13 = vector.broadcast %6 : vector<8x1xf32> to vector<8x128xf32>
    %14 = arith.addf %12, %13 : vector<8x128xf32>
    %15 = arith.maximumf %10, %14 : vector<8x128xf32>
    %cst_10 = arith.constant 0.000000e+00 : f32
    %16 = vector.broadcast %cst_10 : f32 to vector<8x128xf32>
    %17 = arith.maximumf %15, %16 : vector<8x128xf32>
    %c0_11 = arith.constant 0 : index
    %c0_12 = arith.constant 0 : index
    %18 = vector.load %arg6[%c0_11, %c0_12] : memref<8x128xf32, #tpu.memory_space<vmem>>, vector<8x128xf32>
    tpu.vector_store %arg6[%c0_11, %c0_12], %17 {strides = array<i32>} : memref<8x128xf32, #tpu.memory_space<vmem>>, vector<8x128xf32>,
    return
  }
  func.func @transform_0(%arg0: i32) -> (i32, i32) {
    %c0_i32 = arith.constant 0 : i32
    %c0_i32_0 = arith.constant 0 : i32
    return %c0_i32, %arg0 : i32, i32
  }
  func.func @transform_1(%arg0: i32) -> (i32, i32) {
    %c0_i32 = arith.constant 0 : i32
    %c0_i32_0 = arith.constant 0 : i32
    return %c0_i32, %arg0 : i32, i32
  }
  func.func @transform_2(%arg0: i32) -> (i32, i32) {
    %c0_i32 = arith.constant 0 : i32
    %c0_i32_0 = arith.constant 0 : i32
    %c0_i32_1 = arith.constant 0 : i32
    return %c0_i32, %c0_i32_0 : i32, i32
  }
  func.func @transform_3(%arg0: i32) -> (i32, i32) {
    %c0_i32 = arith.constant 0 : i32
    %c0_i32_0 = arith.constant 0 : i32
    %c0_i32_1 = arith.constant 0 : i32
    return %c0_i32, %c0_i32_0 : i32, i32
  }
  func.func @transform_4(%arg0: i32) -> (i32, i32) {
    %c0_i32 = arith.constant 0 : i32
    %c0_i32_0 = arith.constant 0 : i32
    %c0_i32_1 = arith.constant 0 : i32
    return %c0_i32, %c0_i32_0 : i32, i32
  }
  func.func @transform_5(%arg0: i32) -> (i32, i32) {
    %c0_i32 = arith.constant 0 : i32
    %c0_i32_0 = arith.constant 0 : i32
    return %c0_i32, %arg0 : i32, i32
  }
}

module attributes {stable_mosaic.version = 11 : i64} {
  func.func @_conv_stats_kernel(%arg0: i32, %arg1: memref<20x128xf32, #tpu.memory_space<vmem>>, %arg2: memref<20x128xf32, #tpu.memory_space<vmem>>, %arg3: memref<8x20xf32, #tpu.memory_space<vmem>>, %arg4: memref<8x1xf32, #tpu.memory_space<vmem>>, %arg5: memref<8x1xf32, #tpu.memory_space<vmem>>) attributes {dimension_semantics = [#tpu.dimension_semantics<arbitrary>], iteration_bounds = array<i64: 1>, scalar_prefetch = 0 : i64, scratch_operands = 0 : i64, tpu.core_type = #tpu.core_type<tc>, window_params = [{transform_indices = @transform_0, window_bounds = array<i64: 20, 128>}, {transform_indices = @transform_1, window_bounds = array<i64: 20, 128>}, {pipeline_mode = #tpu.pipeline_mode<synchronous>, transform_indices = @transform_2, window_bounds = array<i64: 8, 20>}, {pipeline_mode = #tpu.pipeline_mode<synchronous>, transform_indices = @transform_3, window_bounds = array<i64: 8, 1>}, {pipeline_mode = #tpu.pipeline_mode<synchronous>, transform_indices = @transform_4, window_bounds = array<i64: 8, 1>}]} {
    %c0_i32 = arith.constant 0 : i32
    %0 = arith.cmpi eq, %arg0, %c0_i32 : i32
    %1 = arith.extui %0 : i1 to i32
    %c0_i32_0 = arith.constant 0 : i32
    %2 = arith.cmpi ne, %1, %c0_i32_0 : i32
    scf.if %2 {
      %cst_19 = arith.constant 0.000000e+00 : f32
      %26 = vector.broadcast %cst_19 : f32 to vector<8x1xf32>
      %c0_20 = arith.constant 0 : index
      %c0_21 = arith.constant 0 : index
      %27 = vector.load %arg4[%c0_20, %c0_21] : memref<8x1xf32, #tpu.memory_space<vmem>>, vector<8x1xf32>
      tpu.vector_store %arg4[%c0_20, %c0_21], %26 {strides = array<i32>} : memref<8x1xf32, #tpu.memory_space<vmem>>, vector<8x1xf32>,
      %cst_22 = arith.constant 0.000000e+00 : f32
      %28 = vector.broadcast %cst_22 : f32 to vector<8x1xf32>
      %c0_23 = arith.constant 0 : index
      %c0_24 = arith.constant 0 : index
      %29 = vector.load %arg5[%c0_23, %c0_24] : memref<8x1xf32, #tpu.memory_space<vmem>>, vector<8x1xf32>
      tpu.vector_store %arg5[%c0_23, %c0_24], %28 {strides = array<i32>} : memref<8x1xf32, #tpu.memory_space<vmem>>, vector<8x1xf32>,
    } else {
    }
    %c0 = arith.constant 0 : index
    %c0_1 = arith.constant 0 : index
    %3 = vector.load %arg3[%c0, %c0_1] : memref<8x20xf32, #tpu.memory_space<vmem>>, vector<8x20xf32>
    %c0_2 = arith.constant 0 : index
    %c0_3 = arith.constant 0 : index
    %4 = vector.load %arg1[%c0_2, %c0_3] : memref<20x128xf32, #tpu.memory_space<vmem>>, vector<20x128xf32>
    %cst = arith.constant dense<0.000000e+00> : vector<8x128xf32>
    %5 = tpu.matmul %3, %4, %cst {dimension_numbers = #tpu.dot_dimension_numbers<[1], [0], [0], [1], [0, 0, 1, 1], [], []>} : vector<8x20xf32>, vector<20x128xf32>, vector<8x128xf32> -> vector<8x128xf32>
    %c0_4 = arith.constant 0 : index
    %c0_5 = arith.constant 0 : index
    %6 = vector.load %arg2[%c0_4, %c0_5] : memref<20x128xf32, #tpu.memory_space<vmem>>, vector<20x128xf32>
    %cst_6 = arith.constant dense<0.000000e+00> : vector<8x128xf32>
    %7 = tpu.matmul %3, %6, %cst_6 {dimension_numbers = #tpu.dot_dimension_numbers<[1], [0], [0], [1], [0, 0, 1, 1], [], []>} : vector<8x20xf32>, vector<20x128xf32>, vector<8x128xf32> -> vector<8x128xf32>
    %c0_7 = arith.constant 0 : index
    %c0_8 = arith.constant 0 : index
    %8 = vector.load %arg4[%c0_7, %c0_8] : memref<8x1xf32, #tpu.memory_space<vmem>>, vector<8x1xf32>
    %cst_9 = arith.constant dense<0.000000e+00> : vector<8xf32>
    %9 = vector.multi_reduction <add>, %5, %cst_9 [1] : vector<8x128xf32> to vector<8xf32>
    %10 = vector.shape_cast %9 : vector<8xf32> to vector<8x1xf32>
    %cst_10 = arith.constant dense<0.000000e+00> : vector<8xf32>
    %11 = vector.multi_reduction <add>, %7, %cst_10 [1] : vector<8x128xf32> to vector<8xf32>
    %12 = vector.shape_cast %11 : vector<8xf32> to vector<8x1xf32>
    %13 = arith.addf %10, %12 : vector<8x1xf32>
    %14 = arith.addf %8, %13 : vector<8x1xf32>
    %c0_11 = arith.constant 0 : index
    %c0_12 = arith.constant 0 : index
    %15 = vector.load %arg4[%c0_11, %c0_12] : memref<8x1xf32, #tpu.memory_space<vmem>>, vector<8x1xf32>
    tpu.vector_store %arg4[%c0_11, %c0_12], %14 {strides = array<i32>} : memref<8x1xf32, #tpu.memory_space<vmem>>, vector<8x1xf32>,
    %c0_13 = arith.constant 0 : index
    %c0_14 = arith.constant 0 : index
    %16 = vector.load %arg5[%c0_13, %c0_14] : memref<8x1xf32, #tpu.memory_space<vmem>>, vector<8x1xf32>
    %17 = arith.mulf %5, %5 : vector<8x128xf32>
    %cst_15 = arith.constant dense<0.000000e+00> : vector<8xf32>
    %18 = vector.multi_reduction <add>, %17, %cst_15 [1] : vector<8x128xf32> to vector<8xf32>
    %19 = vector.shape_cast %18 : vector<8xf32> to vector<8x1xf32>
    %20 = arith.mulf %7, %7 : vector<8x128xf32>
    %cst_16 = arith.constant dense<0.000000e+00> : vector<8xf32>
    %21 = vector.multi_reduction <add>, %20, %cst_16 [1] : vector<8x128xf32> to vector<8xf32>
    %22 = vector.shape_cast %21 : vector<8xf32> to vector<8x1xf32>
    %23 = arith.addf %19, %22 : vector<8x1xf32>
    %24 = arith.addf %16, %23 : vector<8x1xf32>
    %c0_17 = arith.constant 0 : index
    %c0_18 = arith.constant 0 : index
    %25 = vector.load %arg5[%c0_17, %c0_18] : memref<8x1xf32, #tpu.memory_space<vmem>>, vector<8x1xf32>
    tpu.vector_store %arg5[%c0_17, %c0_18], %24 {strides = array<i32>} : memref<8x1xf32, #tpu.memory_space<vmem>>, vector<8x1xf32>,
    return
  }
  func.func @transform_0(%arg0: i32) -> (i32, i32) {
    %c0_i32 = arith.constant 0 : i32
    %c0_i32_0 = arith.constant 0 : i32
    return %c0_i32, %arg0 : i32, i32
  }
  func.func @transform_1(%arg0: i32) -> (i32, i32) {
    %c0_i32 = arith.constant 0 : i32
    %c0_i32_0 = arith.constant 0 : i32
    return %c0_i32, %arg0 : i32, i32
  }
  func.func @transform_2(%arg0: i32) -> (i32, i32) {
    %c0_i32 = arith.constant 0 : i32
    %c0_i32_0 = arith.constant 0 : i32
    %c0_i32_1 = arith.constant 0 : i32
    return %c0_i32, %c0_i32_0 : i32, i32
  }
  func.func @transform_3(%arg0: i32) -> (i32, i32) {
    %c0_i32 = arith.constant 0 : i32
    %c0_i32_0 = arith.constant 0 : i32
    %c0_i32_1 = arith.constant 0 : i32
    return %c0_i32, %c0_i32_0 : i32, i32
  }
  func.func @transform_4(%arg0: i32) -> (i32, i32) {
    %c0_i32 = arith.constant 0 : i32
    %c0_i32_0 = arith.constant 0 : i32
    %c0_i32_1 = arith.constant 0 : i32
    return %c0_i32, %c0_i32_0 : i32, i32
  }
}

</mosaic_0001>

<bundles_post_ra>
// kernel: rwconv_block.2
= control target key start
LH: loop header
LB: loop body
LE: loop exit
PB: predicated region body
PF: predicated region fallthrough
CT: control target
= control target key end

     0   :  { %v247_v0 = vmov 0.0|0.0   ;;  %vm248_vm0 = vmmov 0   ;;  %v249_v6 = vmov 0.0   ;;  %vm31_vm1 = vcmask 1043456   ;;  %s314_s0 = inlined_call_operand.vmem [shape: f32[20,128], index: 0, kind: input, shape index: {}]   ;;  %s315_s1 = inlined_call_operand.vmem [shape: f32[20,128], index: 1, kind: input, shape index: {}]   ;;  %s316_s2 = inlined_call_operand.vmem [shape: f32[8,20], index: 2, kind: input, shape index: {}]   ;;  %s317_s3 = inlined_call_operand.vmem [shape: f32[8,1], index: 3, kind: output, shape index: {0}]   ;;  %s318_s4 = inlined_call_operand.vmem [shape: f32[8,1], index: 4, kind: output, shape index: {1}]  }
   0x1   :  { %238 = vmatprep.subr.bf16.mxu0 %v247_v0  ;;  %v24_v1 = vld [vmem:[%s314_s0] sm:$0xff]  ;;  %v25_v2 = vld [vmem:[%s314_s0 + $0x8] sm:$0xff]  ;;  %241 = vmatprep.subr.bf16.mxu1 %v247_v0  ;;  %v26_v8 = vld [vmem:[%s314_s0 + $0x10] sm:$0xf]  ;;  %vm27_vm2 = vcmask 162816   ;;  %vm20_vm3 = vcmask 7168  }
   0x2   :  { %v105_v3 = vld [vmem:[%s315_s1] sm:$0xff]  ;;  %v239_v4 = vpack.c.bf16 %v25_v2, %v24_v1  ;;  %v106_v5 = vld [vmem:[%s315_s1 + $0x8] sm:$0xff]  ;;  %226 = vmatprep.mubr.msk.f32.mxu0 %vm248_vm0, %v249_v6  ;;  %235 = vmatprep.mubr.msk.f32.mxu1 %vm248_vm0, %v249_v6  ;;  %v107_v10 = vld [vmem:[%s315_s1 + $0x10] sm:$0xf]  ;;  %21 = vst.msk [vmem:[%s317_s3] sm:$0xff] %vm20_vm3, %v249_v6 }
   0x3   :  { %v242_v7 = vpack.c.bf16 %v106_v5, %v105_v3  ;;  %v23_v9 = vld [vmem:[%s316_s2] sm:$0xff]  ;;  %22 = vst.msk [vmem:[%s318_s4] sm:$0xff] %vm20_vm3, %v249_v6 }
   0x4   :  { %240 = vmatpush3.bf16.msra.mxu0 %v239_v4 }
   0x5   :  { %224 = vmatprep.subr.mxu0 %v249_v6  ;;  %243 = vmatpush3.bf16.msra.mxu1 %v242_v7 }
   0x6   :  { %233 = vmatprep.subr.mxu1 %v249_v6 }
   0x8   :  { %225 = vmatpush3.msk.msra.mxu0 %vm31_vm1, %v26_v8 }
   0x9   :  { %227 = vmatmul.mubr.msk.f32.vlgmr.msra.gmra.mrb[0].mxu0 %vm27_vm2, %v23_v9  ;;  %234 = vmatpush3.msk.msra.mxu1 %vm31_vm1, %v107_v10  ;;  %v181_v19 = vld [vmem:[%s317_s3] sm:$0xff] }
   0xa   :  { %236 = vmatmul.mubr.msk.f32.vlgmr.msra.gmra.mrb[0].mxu1 %vm27_vm2, %v23_v9  ;;  %v190_v22 = vld [vmem:[%s318_s4] sm:$0xff] }
  0xdc   :  { %v101_v11 = vpop.f32.mrb[0].mxu0 }
  0xdd   :  { %182 = vadd.xlane.f32.xlu0 %v101_v11  ;;  %v228_v12 = vpop.f32.mrb[1].mxu0  ;;  %v177_v13 = vpop.f32.mrb[0].mxu1  ;;  %v191_v14 = vmul.f32 %v101_v11, %v101_v11 }
  0xde   :  { %v237_v15 = vpop.f32.mrb[1].mxu1  ;;  %v194_v16 = vmul.f32 %v177_v13, %v177_v13 }
  0xdf   :  { %192 = vadd.xlane.f32.xlu1 %v191_v14 }
  0xe1   :  { %184 = vadd.xlane.f32.xlu0 %v177_v13 }
  0xe3   :  { %195 = vadd.xlane.f32.xlu1 %v194_v16 }
 0x16a   :  { %v183_v17 = vpop.xlane.xlu0 %182 }
 0x16c   :  { %v193_v18 = vpop.xlane.xlu1 %192 }
 0x16e   :  { %v185_v20 = vpop.xlane.xlu0 %184 }
 0x16f   :  { %v186_v21 = vadd.f32 %v185_v20, %v183_v17 }
 0x170   :  { %v196_v23 = vpop.xlane.xlu1 %195 }
 0x171   :  { %v187_v24 = vadd.f32 %v186_v21, %v181_v19  ;;  %v197_v25 = vadd.f32 %v196_v23, %v193_v18 }
 0x173   :  { %189 = vst.msk [vmem:[%s317_s3] sm:$0xff] %vm20_vm3, %v187_v24  ;;  %v198_v26 = vadd.f32 %v197_v25, %v190_v22 }
 0x175   :  { %199 = vst.msk [vmem:[%s318_s4] sm:$0xff] %vm20_vm3, %v198_v26 }

// kernel: rwconv_block.3
= control target key start
LH: loop header
LB: loop body
LE: loop exit
PB: predicated region body
PF: predicated region fallthrough
CT: control target
= control target key end

     0   :  { %v242_v0 = vmov 0.0|0.0   ;;  %vm243_vm0 = vmmov 0   ;;  %v244_v6 = vmov 0.0   ;;  %v245_v8 = vmov 0   ;;  %s306_s0 = inlined_call_operand.vmem [shape: f32[20,128], index: 0, kind: input, shape index: {}]   ;;  %s307_s1 = inlined_call_operand.vmem [shape: f32[20,128], index: 1, kind: input, shape index: {}]   ;;  %s308_s3 = inlined_call_operand.vmem [shape: f32[8,1], index: 3, kind: input, shape index: {}]   ;;  %s309_s4 = inlined_call_operand.vmem [shape: f32[8,1], index: 4, kind: input, shape index: {}]   ;;  %s310_s2 = inlined_call_operand.vmem [shape: f32[8,20], index: 2, kind: input, shape index: {}]   ;;  %s311_s5 = inlined_call_operand.vmem [shape: f32[8,128], index: 5, kind: output, shape index: {}]  }
   0x1   :  { %231 = vmatprep.subr.bf16.mxu0 %v242_v0  ;;  %234 = vmatprep.subr.bf16.mxu1 %v242_v0  ;;  %v21_v1 = vld [vmem:[%s306_s0] sm:$0xff]  ;;  %v22_v2 = vld [vmem:[%s306_s0 + $0x8] sm:$0xff]  ;;  %v23_v10 = vld [vmem:[%s306_s0 + $0x10] sm:$0xf]  ;;  %vm28_vm1 = vcmask 1043456   ;;  %vm24_vm2 = vcmask 162816  }
   0x2   :  { %v102_v3 = vld [vmem:[%s307_s1] sm:$0xff]  ;;  %v232_v4 = vpack.c.bf16 %v22_v2, %v21_v1  ;;  %v103_v5 = vld [vmem:[%s307_s1 + $0x8] sm:$0xff]  ;;  %219 = vmatprep.mubr.msk.f32.mxu0 %vm243_vm0, %v244_v6  ;;  %228 = vmatprep.mubr.msk.f32.mxu1 %vm243_vm0, %v244_v6  ;;  %v104_v12 = vld [vmem:[%s307_s1 + $0x10] sm:$0xf] }
   0x3   :  { %v235_v7 = vpack.c.bf16 %v103_v5, %v102_v3  ;;  %241 = vset.pattern.permute.xlu0 %v245_v8  ;;  %v178_v9 = vld [vmem:[%s308_s3] sm:$0xff] }
   0x4   :  { %233 = vmatpush3.bf16.msra.mxu0 %v232_v4  ;;  %182 = vperm.xlu0 %241, %v178_v9   ;;  %v179_v11 = vld [vmem:[%s309_s4] sm:$0xff] }
   0x5   :  { %236 = vmatpush3.bf16.msra.mxu1 %v235_v7  ;;  %217 = vmatprep.subr.mxu0 %v244_v6  ;;  %v20_v13 = vld [vmem:[%s310_s2] sm:$0xff] }
   0x6   :  { %226 = vmatprep.subr.mxu1 %v244_v6 }
   0x8   :  { %218 = vmatpush3.msk.msra.mxu0 %vm28_vm1, %v23_v10  ;;  %188 = vperm.xlu0 %241, %v179_v11  }
   0x9   :  { %227 = vmatpush3.msk.msra.mxu1 %vm28_vm1, %v104_v12  ;;  %220 = vmatmul.mubr.msk.f32.vlgmr.msra.gmra.mrb[0].mxu0 %vm24_vm2, %v20_v13 }
   0xa   :  { %229 = vmatmul.mubr.msk.f32.vlgmr.msra.gmra.mrb[0].mxu1 %vm24_vm2, %v20_v13 }
  0x83   :  { %v183_v14 = vpop.permute.xlu0 %182 }
  0x87   :  { %v189_v19 = vpop.permute.xlu0 %188 }
  0xdc   :  { %v98_v15 = vpop.f32.mrb[0].mxu0 }
  0xdd   :  { %v185_v16 = vmul.f32 %v183_v14, %v98_v15  ;;  %v174_v17 = vpop.f32.mrb[0].mxu1  ;;  %v221_v18 = vpop.f32.mrb[1].mxu0 }
  0xde   :  { %v192_v20 = vmul.f32 %v183_v14, %v174_v17  ;;  %v230_v21 = vpop.f32.mrb[1].mxu1 }
  0xdf   :  { %v191_v22 = vadd.f32 %v189_v19, %v185_v16 }
  0xe0   :  { %v193_v23 = vadd.f32 %v192_v20, %v189_v19 }
  0xe2   :  { %v194_v24 = vmax.f32 %v191_v22, %v193_v23 }
  0xe4   :  { %v195_v25 = vmax.f32 %v194_v24, 0.0 }
  0xe6   :  { %196 = vst [vmem:[%s311_s5] sm:$0xff] %v195_v25 }

</bundles_post_ra>
